<compile_context>
chip_gen: v5e
topology: v5e:2x2
jax: 0.10.0
libtpu: 0.0.40
codegen_flags: <defaults>
</compile_context>

<pallas_src>
import functools

import jax
import jax.numpy as jnp
from jax import lax
from jax.experimental import pallas as pl
from jax.experimental.pallas import tpu as pltpu


# ----------------------------------------------------------------------------
# Hardware-aware configuration
# ----------------------------------------------------------------------------
@functools.lru_cache(maxsize=1)
def _hw_config():
    """Generation-aware tile targets and scoped-VMEM budget."""
    vmem_bytes = 64 * 1024 * 1024            # conservative default (v7x-sized)
    try:
        vmem_bytes = int(pltpu.get_tpu_info().vmem_capacity_bytes)
    except Exception:                        # any failure -> conservative default
        pass
    if vmem_bytes >= 100 * 1024 * 1024:      # v5e / v6e: 128 MiB physical VMEM
        return {
            "vmem_limit": 96 * 1024 * 1024,
            "proj_tm": 1024, "proj_tn": 1024, "proj_tk": 512,
            "attn_tq": 256, "attn_tkv": 256,
        }
    return {                                 # v7x: 64 MiB physical VMEM per TC
        "vmem_limit": 40 * 1024 * 1024,
        "proj_tm": 512, "proj_tn": 512, "proj_tk": 512,
        "attn_tq": 256, "attn_tkv": 256,
    }


def _pick_tile(dim, target, mult):
    """Largest t <= target with dim % t == 0 and t % mult == 0, else dim.

    Falling back to the full axis is always legal: a block equal to the array
    dimension is exempt from the (8,128) divisibility rule."""
    if dim <= target:
        return dim
    for t in range(target, mult - 1, -1):
        if dim % t == 0 and t % mult == 0:
            return t
    return dim


# ----------------------------------------------------------------------------
# Kernel 1/3: lane-dense tiled matmul  out = x @ w   (used for both projections)
# ----------------------------------------------------------------------------
def _matmul_kernel(x_ref, w_ref, o_ref, acc_ref):
    kd = pl.program_id(2)

    @pl.when(kd == 0)
    def _():
        acc_ref[...] = jnp.zeros_like(acc_ref)

    acc_ref[...] += jnp.dot(x_ref[...], w_ref[...],
                            preferred_element_type=jnp.float32)

    @pl.when(kd == pl.num_programs(2) - 1)
    def _():
        o_ref[...] = acc_ref[...].astype(o_ref.dtype)


def _matmul(x, w, *, tm_target, tn_target, tk_target, vmem_limit):
    """x: (M, K), w: (K, N) -> (M, N); K is the innermost 'arbitrary' axis."""
    M, K = x.shape
    K2, N = w.shape
    assert K == K2
    tm = _pick_tile(M, tm_target, 8)
    tn = _pick_tile(N, tn_target, 128)
    tk = _pick_tile(K, tk_target, 128)
    grid = (M // tm, N // tn, K // tk)
    cost = pl.CostEstimate(
        flops=int(2 * M * N * K), transcendentals=0,
        bytes_accessed=int((M * K + K * N + M * N) * x.dtype.itemsize))
    return pl.pallas_call(
        _matmul_kernel,
        out_shape=jax.ShapeDtypeStruct((M, N), x.dtype),
        grid=grid,
        in_specs=[pl.BlockSpec((tm, tk), lambda i, j, k: (i, k)),
                  pl.BlockSpec((tk, tn), lambda i, j, k: (k, j))],
        out_specs=pl.BlockSpec((tm, tn), lambda i, j, k: (i, j)),
        scratch_shapes=[pltpu.VMEM((tm, tn), jnp.float32)],
        compiler_params=pltpu.CompilerParams(
            dimension_semantics=("parallel", "parallel", "arbitrary"),
            vmem_limit_bytes=vmem_limit),
        cost_estimate=cost,
    )(x, w)


# ----------------------------------------------------------------------------
# Kernel 2/3: flash-style scaled-dot-product attention (online softmax)
# ----------------------------------------------------------------------------
def _as2d(v):
    return v.reshape(v.shape[-2], v.shape[-1])


def _flash_attn_kernel(q_ref, k_ref, v_ref, o_ref, m_sc, l_sc, acc_sc):
    ki = pl.program_id(3)

    @pl.when(ki == 0)
    def _():
        m_sc[...] = jnp.full_like(m_sc, -jnp.inf)
        l_sc[...] = jnp.zeros_like(l_sc)
        acc_sc[...] = jnp.zeros_like(acc_sc)

    q = _as2d(q_ref[...])                    # (tq, Dh); softmax scale pre-folded
    k = _as2d(k_ref[...])                    # (tkv, Dh)
    v = _as2d(v_ref[...])                    # (tkv, Dh)

    # scores_ij = sum_d q_id * k_jd   (native dtype into the MXU, f32 acc)
    s = lax.dot_general(q, k, (((1,), (1,)), ((), ())),
                        preferred_element_type=jnp.float32)          # (tq, tkv)

    m_prev = m_sc[...]
    m_new = jnp.maximum(m_prev, jnp.max(s, axis=-1, keepdims=True))
    alpha = jnp.exp(m_prev - m_new)
    p = jnp.exp(s - m_new)
    l_sc[...] = alpha * l_sc[...] + jnp.sum(p, axis=-1, keepdims=True)
    acc_sc[...] = alpha * acc_sc[...] + jnp.dot(
        p.astype(v.dtype), v, preferred_element_type=jnp.float32)
    m_sc[...] = m_new

    # TODO(synk): optional boolean attention mask (mask=None module path only).

    @pl.when(ki == pl.num_programs(3) - 1)
    def _():
        inv_l = pl.reciprocal(l_sc[...], approx=False)   # once per output tile
        out = (acc_sc[...] * inv_l).astype(o_ref.dtype)
        o_ref[...] = out.reshape(o_ref.shape)


def _flash_attention_2d(qkv2d, *, batch, seq, num_heads, dim_head, tq, tkv,
                        vmem_limit):
    """q/k/v read as lane-aligned column blocks of the 2-D projection output
    (columns ordered (k, h, d)); output is lane-dense (M, H*Dh), (h, d)-major."""
    M = batch * seq
    H, Dh = num_heads, dim_head
    nq, nkv = seq // tq, seq // tkv
    grid = (H, batch, nq, nkv)   # head axis leading -> both v7x cores busy at B=1
    cost = pl.CostEstimate(
        flops=int(4 * batch * H * seq * seq * Dh),
        transcendentals=int(batch * H * seq * seq),
        bytes_accessed=int((qkv2d.size + M * H * Dh) * qkv2d.dtype.itemsize))
    return pl.pallas_call(
        _flash_attn_kernel,
        out_shape=jax.ShapeDtypeStruct((M, H * Dh), qkv2d.dtype),
        grid=grid,
        in_specs=[
            pl.BlockSpec((tq, Dh), lambda h, b, qi, ki: (b * nq + qi, h)),
            pl.BlockSpec((tkv, Dh), lambda h, b, qi, ki: (b * nkv + ki, H + h)),
            pl.BlockSpec((tkv, Dh), lambda h, b, qi, ki: (b * nkv + ki, 2 * H + h)),
        ],
        out_specs=pl.BlockSpec((tq, Dh), lambda h, b, qi, ki: (b * nq + qi, h)),
        scratch_shapes=[pltpu.VMEM((tq, 1), jnp.float32),    # running max m
                        pltpu.VMEM((tq, 1), jnp.float32),    # running sum l
                        pltpu.VMEM((tq, Dh), jnp.float32)],  # running acc
        compiler_params=pltpu.CompilerParams(
            dimension_semantics=("parallel", "parallel", "parallel", "arbitrary"),
            vmem_limit_bytes=vmem_limit),
        cost_estimate=cost,
    )(qkv2d, qkv2d, qkv2d)


def _flash_attention_5d(qkv5, *, tq, tkv, vmem_limit):
    """Fallback for dim_head not a multiple of 128: qkv5 is (3, H, B, T, Dh)."""
    _, H, B, T, Dh = qkv5.shape
    nq, nkv = T // tq, T // tkv
    grid = (H, B, nq, nkv)
    cost = pl.CostEstimate(
        flops=int(4 * B * H * T * T * Dh),
        transcendentals=int(B * H * T * T),
        bytes_accessed=int((qkv5.size + B * H * T * Dh) * qkv5.dtype.itemsize))
    return pl.pallas_call(
        _flash_attn_kernel,
        out_shape=jax.ShapeDtypeStruct((B, H, T, Dh), qkv5.dtype),
        grid=grid,
        in_specs=[
            pl.BlockSpec((1, 1, 1, tq, Dh), lambda h, b, qi, ki: (0, h, b, qi, 0)),
            pl.BlockSpec((1, 1, 1, tkv, Dh), lambda h, b, qi, ki: (1, h, b, ki, 0)),
            pl.BlockSpec((1, 1, 1, tkv, Dh), lambda h, b, qi, ki: (2, h, b, ki, 0)),
        ],
        out_specs=pl.BlockSpec((1, 1, tq, Dh), lambda h, b, qi, ki: (b, h, qi, 0)),
        scratch_shapes=[pltpu.VMEM((tq, 1), jnp.float32),
                        pltpu.VMEM((tq, 1), jnp.float32),
                        pltpu.VMEM((tq, Dh), jnp.float32)],
        compiler_params=pltpu.CompilerParams(
            dimension_semantics=("parallel", "parallel", "parallel", "arbitrary"),
            vmem_limit_bytes=vmem_limit),
        cost_estimate=cost,
    )(qkv5, qkv5, qkv5)


# ----------------------------------------------------------------------------
# Parameter prep (one-time, weight-sized; hoisted out of the per-call forward)
# ----------------------------------------------------------------------------
def prepare_params(w_qkv, w_out, *, dim, num_heads, dim_head):
    """
    w_qkv : (3*H*Dh, D)  -- nn.Linear(dim, 3*H*Dh, bias=False).weight
    w_out : (D, H*Dh)    -- nn.Linear(H*Dh, dim, bias=False).weight

    Returns
      w_qkv_p : (D, 3*H*Dh)  columns ordered (k, h, d); q columns pre-scaled by
                dim**-0.5 (the module's softmax scale, folded into W_q).
      w_out_p : (H*Dh, D)    ready for a plain r2d @ w_out_p matmul (r2d's
                (h, d) column order matches w_out's input-feature order).
    """
    H, Dh, D = num_heads, dim_head, dim
    # to_qvk output features follow einops '(d k h)' (d slowest, h fastest);
    # regroup columns as (k, h, d) so q/k/v and heads are contiguous slabs.
    w = w_qkv.reshape(Dh, 3, H, D).transpose(3, 1, 2, 0).reshape(D, 3 * H * Dh)
    w = w.at[:, : H * Dh].multiply(float(D) ** -0.5)
    return w, w_out.T


# ----------------------------------------------------------------------------
# Module forward (mask=None path)
# ----------------------------------------------------------------------------
def multi_head_self_attention(x, w_qkv_p, w_out_p, *, num_heads, dim_head):
    """
    x        : (B, T, D)
    w_qkv_p  : (D, 3*H*Dh)   from prepare_params
    w_out_p  : (H*Dh, D)     from prepare_params
    returns  : (B, T, D)
    """
    B, T, D = x.shape
    H, Dh = num_heads, dim_head
    M = B * T
    cfg = _hw_config()

    # 1) QKV projection: one lane-dense (M,D)x(D,3*H*Dh) matmul; columns are
    #    (k, h, d)-ordered so per-(qkv, head) slices are plain column blocks.
    qkv2d = _matmul(x.reshape(M, D), w_qkv_p,
                    tm_target=cfg["proj_tm"], tn_target=cfg["proj_tn"],
                    tk_target=cfg["proj_tk"], vmem_limit=cfg["vmem_limit"])

    # 2) Flash attention (online softmax, f32 running max/sum/acc in VMEM).
    tq = _pick_tile(T, cfg["attn_tq"], 8)
    tkv = _pick_tile(T, cfg["attn_tkv"], 8)
    if Dh % 128 == 0 and T % 8 == 0:
        # Lane-aligned head columns: read q/k/v straight from the 2-D
        # projection output and write a lane-dense (M, H*Dh) result consumed
        # directly by the output projection -- zero activation transposes.
        r2d = _flash_attention_2d(qkv2d, batch=B, seq=T, num_heads=H,
                                  dim_head=Dh, tq=tq, tkv=tkv,
                                  vmem_limit=cfg["vmem_limit"])
    else:
        # Small / odd dim_head: fall back to a (3,H,B,T,Dh) layout (one
        # activation-sized transpose) so every block keeps Dh as a full
        # trailing axis and satisfies the (8,128) tiling rules.
        qkv5 = qkv2d.reshape(B, T, 3, H, Dh).transpose(2, 3, 0, 1, 4)
        r = _flash_attention_5d(qkv5, tq=tq, tkv=tkv,
                                vmem_limit=cfg["vmem_limit"])     # (B, H, T, Dh)
        r2d = r.transpose(0, 2, 1, 3).reshape(M, H * Dh)

    # 3) Output projection: lane-dense (M,H*Dh)x(H*Dh,D) matmul; the head merge
    #    'b h t d -> b t (h d)' is just the (h, d) column order of r2d.
    out2d = _matmul(r2d, w_out_p,
                    tm_target=cfg["proj_tm"], tn_target=cfg["proj_tn"],
                    tk_target=cfg["proj_tk"], vmem_limit=cfg["vmem_limit"])
    return out2d.reshape(B, T, D)


# ----------------------------------------------------------------------------
# Pure-JAX reference (mirrors the PyTorch module; note: scale = dim**-0.5)
# ----------------------------------------------------------------------------
def _reference(x, w_qkv, w_out, *, num_heads, dim_head):
    B, T, D = x.shape
    qkv = x @ w_qkv.T
    qkv = qkv.reshape(B, T, dim_head, 3, num_heads)      # '(d k h)' factoring
    qkv = jnp.transpose(qkv, (3, 0, 4, 1, 2))            # (3, B, H, T, Dh)
    q, k, v = qkv[0], qkv[1], qkv[2]
    s = jnp.einsum("bhid,bhjd->bhij", q, k) * (float(D) ** -0.5)
    a = jax.nn.softmax(s, axis=-1)
    r = jnp.einsum("bhij,bhjd->bhid", a, v)
    r = jnp.transpose(r, (0, 2, 1, 3)).reshape(B, T, num_heads * dim_head)
    return r @ w_out.T


# ----------------------------------------------------------------------------
# Main
# ----------------------------------------------------------------------------
def _run_case(batch, seq, dim, num_heads, seed):
    dim_head = dim // num_heads              # module default: dim / num_heads
    wdim = num_heads * dim_head
    key = jax.random.PRNGKey(seed)
    kx, kqkv, kout = jax.random.split(key, 3)
    x = jax.random.normal(kx, (batch, seq, dim), dtype=jnp.float32)
    w_qkv = 0.05 * jax.random.normal(kqkv, (3 * wdim, dim), dtype=jnp.float32)
    w_out = 0.05 * jax.random.normal(kout, (dim, wdim), dtype=jnp.float32)

    # One-time parameter prep (hoisted out of the per-call forward).
    w_qkv_p, w_out_p = prepare_params(w_qkv, w_out, dim=dim,
                                      num_heads=num_heads, dim_head=dim_head)
    fwd = jax.jit(functools.partial(multi_head_self_attention,
                                    num_heads=num_heads, dim_head=dim_head))
    y = jax.block_until_ready(fwd(x, w_qkv_p, w_out_p))

    y_ref = _reference(x, w_qkv, w_out, num_heads=num_heads, dim_head=dim_head)
    assert y.shape == (batch, seq, dim)
    assert jnp.allclose(y, y_ref, atol=1e-2, rtol=1e-2), (
        f"mismatch vs JAX reference (B={batch}, T={seq}, D={dim}, H={num_heads})")


if __name__ == "__main__":
    # Small-dim_head config (module defaults): exercises the fallback path.
    _run_case(batch=2, seq=8, dim=32, num_heads=4, seed=0)
    # dim_head = 128 config: exercises the fully lane-dense zero-transpose path.
    _run_case(batch=1, seq=16, dim=256, num_heads=2, seed=1)
    print("KERNEL_OK")
</pallas_src>

<mosaic_0001>
module attributes {stable_mosaic.version = 11 : i64} {
  func.func @_matmul_kernel(%arg0: i32, %arg1: i32, %arg2: i32, %arg3: memref<16x32xf32, #tpu.memory_space<vmem>>, %arg4: memref<32x96xf32, #tpu.memory_space<vmem>>, %arg5: memref<16x96xf32, #tpu.memory_space<vmem>>, %arg6: memref<16x96xf32, #tpu.memory_space<vmem>>) attributes {dimension_semantics = [#tpu.dimension_semantics<parallel>, #tpu.dimension_semantics<parallel>, #tpu.dimension_semantics<arbitrary>], iteration_bounds = array<i64: 1, 1, 1>, scalar_prefetch = 0 : i64, scratch_operands = 1 : i64, tpu.core_type = #tpu.core_type<tc>, window_params = [{transform_indices = @transform_0, window_bounds = array<i64: 16, 32>}, {transform_indices = @transform_1, window_bounds = array<i64: 32, 96>}, {transform_indices = @transform_2, window_bounds = array<i64: 16, 96>}]} {
    %c0_i32 = arith.constant 0 : i32
    %0 = arith.cmpi eq, %arg2, %c0_i32 : i32
    %1 = arith.extui %0 : i1 to i32
    %c0_i32_0 = arith.constant 0 : i32
    %2 = arith.cmpi ne, %1, %c0_i32_0 : i32
    scf.if %2 {
      %cst_10 = arith.constant 0.000000e+00 : f32
      %12 = vector.broadcast %cst_10 : f32 to vector<16x96xf32>
      %c0_11 = arith.constant 0 : index
      %c0_12 = arith.constant 0 : index
      %13 = vector.load %arg6[%c0_11, %c0_12] : memref<16x96xf32, #tpu.memory_space<vmem>>, vector<16x96xf32>
      tpu.vector_store %arg6[%c0_11, %c0_12], %12 {strides = array<i32>} : memref<16x96xf32, #tpu.memory_space<vmem>>, vector<16x96xf32>,
    } else {
    }
    %c0 = arith.constant 0 : index
    %c0_1 = arith.constant 0 : index
    %3 = vector.load %arg6[%c0, %c0_1] : memref<16x96xf32, #tpu.memory_space<vmem>>, vector<16x96xf32>
    %c0_2 = arith.constant 0 : index
    %c0_3 = arith.constant 0 : index
    %4 = vector.load %arg3[%c0_2, %c0_3] : memref<16x32xf32, #tpu.memory_space<vmem>>, vector<16x32xf32>
    %c0_4 = arith.constant 0 : index
    %c0_5 = arith.constant 0 : index
    %5 = vector.load %arg4[%c0_4, %c0_5] : memref<32x96xf32, #tpu.memory_space<vmem>>, vector<32x96xf32>
    %cst = arith.constant dense<0.000000e+00> : vector<16x96xf32>
    %6 = tpu.matmul %4, %5, %cst {dimension_numbers = #tpu.dot_dimension_numbers<[1], [0], [0], [1], [0, 0, 1, 1], [], []>} : vector<16x32xf32>, vector<32x96xf32>, vector<16x96xf32> -> vector<16x96xf32>
    %7 = arith.addf %3, %6 : vector<16x96xf32>
    %c0_6 = arith.constant 0 : index
    %c0_7 = arith.constant 0 : index
    %8 = vector.load %arg6[%c0_6, %c0_7] : memref<16x96xf32, #tpu.memory_space<vmem>>, vector<16x96xf32>
    tpu.vector_store %arg6[%c0_6, %c0_7], %7 {strides = array<i32>} : memref<16x96xf32, #tpu.memory_space<vmem>>, vector<16x96xf32>,
    %c0_i32_8 = arith.constant 0 : i32
    %9 = arith.cmpi eq, %arg2, %c0_i32_8 : i32
    %10 = arith.extui %9 : i1 to i32
    %c0_i32_9 = arith.constant 0 : i32
    %11 = arith.cmpi ne, %10, %c0_i32_9 : i32
    scf.if %11 {
      %c0_10 = arith.constant 0 : index
      %c0_11 = arith.constant 0 : index
      %12 = vector.load %arg6[%c0_10, %c0_11] : memref<16x96xf32, #tpu.memory_space<vmem>>, vector<16x96xf32>
      %c0_12 = arith.constant 0 : index
      %c0_13 = arith.constant 0 : index
      %13 = vector.load %arg5[%c0_12, %c0_13] : memref<16x96xf32, #tpu.memory_space<vmem>>, vector<16x96xf32>
      tpu.vector_store %arg5[%c0_12, %c0_13], %12 {strides = array<i32>} : memref<16x96xf32, #tpu.memory_space<vmem>>, vector<16x96xf32>,
    } else {
    }
    return
  }
  func.func @transform_0(%arg0: i32, %arg1: i32, %arg2: i32) -> (i32, i32) {
    %c0_i32 = arith.constant 0 : i32
    return %arg0, %arg2 : i32, i32
  }
  func.func @transform_1(%arg0: i32, %arg1: i32, %arg2: i32) -> (i32, i32) {
    %c0_i32 = arith.constant 0 : i32
    return %arg2, %arg1 : i32, i32
  }
  func.func @transform_2(%arg0: i32, %arg1: i32, %arg2: i32) -> (i32, i32) {
    %c0_i32 = arith.constant 0 : i32
    return %arg0, %arg1 : i32, i32
  }
}

module attributes {stable_mosaic.version = 11 : i64} {
  func.func @_flash_attn_kernel(%arg0: i32, %arg1: i32, %arg2: i32, %arg3: i32, %arg4: memref<1x1x1x8x8xf32, #tpu.memory_space<vmem>>, %arg5: memref<1x1x1x8x8xf32, #tpu.memory_space<vmem>>, %arg6: memref<1x1x1x8x8xf32, #tpu.memory_space<vmem>>, %arg7: memref<1x1x8x8xf32, #tpu.memory_space<vmem>>, %arg8: memref<8x1xf32, #tpu.memory_space<vmem>>, %arg9: memref<8x1xf32, #tpu.memory_space<vmem>>, %arg10: memref<8x8xf32, #tpu.memory_space<vmem>>) attributes {dimension_semantics = [#tpu.dimension_semantics<parallel>, #tpu.dimension_semantics<parallel>, #tpu.dimension_semantics<parallel>, #tpu.dimension_semantics<arbitrary>], iteration_bounds = array<i64: 4, 2, 1, 1>, scalar_prefetch = 0 : i64, scratch_operands = 3 : i64, tpu.core_type = #tpu.core_type<tc>, window_params = [{transform_indices = @transform_0, window_bounds = array<i64: 1, 1, 1, 8, 8>}, {transform_indices = @transform_1, window_bounds = array<i64: 1, 1, 1, 8, 8>}, {transform_indices = @transform_2, window_bounds = array<i64: 1, 1, 1, 8, 8>}, {transform_indices = @transform_3, window_bounds = array<i64: 1, 1, 8, 8>}]} {
    %c0_i32 = arith.constant 0 : i32
    %0 = arith.cmpi eq, %arg3, %c0_i32 : i32
    %1 = arith.extui %0 : i1 to i32
    %c0_i32_0 = arith.constant 0 : i32
    %2 = arith.cmpi ne, %1, %c0_i32_0 : i32
    scf.if %2 {
      %cst_32 = arith.constant 0xFF800000 : f32
      %35 = vector.broadcast %cst_32 : f32 to vector<8x1xf32>
      %c0_33 = arith.constant 0 : index
      %c0_34 = arith.constant 0 : index
      %36 = vector.load %arg8[%c0_33, %c0_34] : memref<8x1xf32, #tpu.memory_space<vmem>>, vector<8x1xf32>
      tpu.vector_store %arg8[%c0_33, %c0_34], %35 {strides = array<i32>} : memref<8x1xf32, #tpu.memory_space<vmem>>, vector<8x1xf32>,
      %cst_35 = arith.constant 0.000000e+00 : f32
      %37 = vector.broadcast %cst_35 : f32 to vector<8x1xf32>
      %c0_36 = arith.constant 0 : index
      %c0_37 = arith.constant 0 : index
      %38 = vector.load %arg9[%c0_36, %c0_37] : memref<8x1xf32, #tpu.memory_space<vmem>>, vector<8x1xf32>
      tpu.vector_store %arg9[%c0_36, %c0_37], %37 {strides = array<i32>} : memref<8x1xf32, #tpu.memory_space<vmem>>, vector<8x1xf32>,
      %cst_38 = arith.constant 0.000000e+00 : f32
      %39 = vector.broadcast %cst_38 : f32 to vector<8x8xf32>
      %c0_39 = arith.constant 0 : index
      %c0_40 = arith.constant 0 : index
      %40 = vector.load %arg10[%c0_39, %c0_40] : memref<8x8xf32, #tpu.memory_space<vmem>>, vector<8x8xf32>
      tpu.vector_store %arg10[%c0_39, %c0_40], %39 {strides = array<i32>} : memref<8x8xf32, #tpu.memory_space<vmem>>, vector<8x8xf32>,
    } else {
    }
    %c0 = arith.constant 0 : index
    %c0_1 = arith.constant 0 : index
    %c0_2 = arith.constant 0 : index
    %c0_3 = arith.constant 0 : index
    %c0_4 = arith.constant 0 : index
    %3 = vector.load %arg4[%c0, %c0_1, %c0_2, %c0_3, %c0_4] : memref<1x1x1x8x8xf32, #tpu.memory_space<vmem>>, vector<1x1x1x8x8xf32>
    %4 = vector.shape_cast %3 : vector<1x1x1x8x8xf32> to vector<8x8xf32>
    %c0_5 = arith.constant 0 : index
    %c0_6 = arith.constant 0 : index
    %c0_7 = arith.constant 0 : index
    %c0_8 = arith.constant 0 : index
    %c0_9 = arith.constant 0 : index
    %5 = vector.load %arg5[%c0_5, %c0_6, %c0_7, %c0_8, %c0_9] : memref<1x1x1x8x8xf32, #tpu.memory_space<vmem>>, vector<1x1x1x8x8xf32>
    %6 = vector.shape_cast %5 : vector<1x1x1x8x8xf32> to vector<8x8xf32>
    %c0_10 = arith.constant 0 : index
    %c0_11 = arith.constant 0 : index
    %c0_12 = arith.constant 0 : index
    %c0_13 = arith.constant 0 : index
    %c0_14 = arith.constant 0 : index
    %7 = vector.load %arg6[%c0_10, %c0_11, %c0_12, %c0_13, %c0_14] : memref<1x1x1x8x8xf32, #tpu.memory_space<vmem>>, vector<1x1x1x8x8xf32>
    %8 = vector.shape_cast %7 : vector<1x1x1x8x8xf32> to vector<8x8xf32>
    %cst = arith.constant dense<0.000000e+00> : vector<8x8xf32>
    %9 = tpu.matmul %4, %6, %cst {dimension_numbers = #tpu.dot_dimension_numbers<[1], [1], [0], [0], [0, 0, 1, 0], [], []>} : vector<8x8xf32>, vector<8x8xf32>, vector<8x8xf32> -> vector<8x8xf32>
    %c0_15 = arith.constant 0 : index
    %c0_16 = arith.constant 0 : index
    %10 = vector.load %arg8[%c0_15, %c0_16] : memref<8x1xf32, #tpu.memory_space<vmem>>, vector<8x1xf32>
    %cst_17 = arith.constant dense<0xFF800000> : vector<8xf32>
    %11 = vector.multi_reduction <maximumf>, %9, %cst_17 [1] : vector<8x8xf32> to vector<8xf32>
    %12 = vector.shape_cast %11 : vector<8xf32> to vector<8x1xf32>
    %13 = arith.maximumf %10, %12 : vector<8x1xf32>
    %14 = arith.subf %10, %13 : vector<8x1xf32>
    %15 = math.exp %14 : vector<8x1xf32>
    %16 = vector.broadcast %13 : vector<8x1xf32> to vector<8x8xf32>
    %17 = arith.subf %9, %16 : vector<8x8xf32>
    %18 = math.exp %17 : vector<8x8xf32>
    %c0_18 = arith.constant 0 : index
    %c0_19 = arith.constant 0 : index
    %19 = vector.load %arg9[%c0_18, %c0_19] : memref<8x1xf32, #tpu.memory_space<vmem>>, vector<8x1xf32>
    %20 = arith.mulf %15, %19 : vector<8x1xf32>
    %cst_20 = arith.constant dense<0.000000e+00> : vector<8xf32>
    %21 = vector.multi_reduction <add>, %18, %cst_20 [1] : vector<8x8xf32> to vector<8xf32>
    %22 = vector.shape_cast %21 : vector<8xf32> to vector<8x1xf32>
    %23 = arith.addf %20, %22 : vector<8x1xf32>
    %c0_21 = arith.constant 0 : index
    %c0_22 = arith.constant 0 : index
    %24 = vector.load %arg9[%c0_21, %c0_22] : memref<8x1xf32, #tpu.memory_space<vmem>>, vector<8x1xf32>
    tpu.vector_store %arg9[%c0_21, %c0_22], %23 {strides = array<i32>} : memref<8x1xf32, #tpu.memory_space<vmem>>, vector<8x1xf32>,
    %c0_23 = arith.constant 0 : index
    %c0_24 = arith.constant 0 : index
    %25 = vector.load %arg10[%c0_23, %c0_24] : memref<8x8xf32, #tpu.memory_space<vmem>>, vector<8x8xf32>
    %26 = vector.broadcast %15 : vector<8x1xf32> to vector<8x8xf32>
    %27 = arith.mulf %26, %25 : vector<8x8xf32>
    %cst_25 = arith.constant dense<0.000000e+00> : vector<8x8xf32>
    %28 = tpu.matmul %18, %8, %cst_25 {dimension_numbers = #tpu.dot_dimension_numbers<[1], [0], [0], [1], [0, 0, 1, 1], [], []>} : vector<8x8xf32>, vector<8x8xf32>, vector<8x8xf32> -> vector<8x8xf32>
    %29 = arith.addf %27, %28 : vector<8x8xf32>
    %c0_26 = arith.constant 0 : index
    %c0_27 = arith.constant 0 : index
    %30 = vector.load %arg10[%c0_26, %c0_27] : memref<8x8xf32, #tpu.memory_space<vmem>>, vector<8x8xf32>
    tpu.vector_store %arg10[%c0_26, %c0_27], %29 {strides = array<i32>} : memref<8x8xf32, #tpu.memory_space<vmem>>, vector<8x8xf32>,
    %c0_28 = arith.constant 0 : index
    %c0_29 = arith.constant 0 : index
    %31 = vector.load %arg8[%c0_28, %c0_29] : memref<8x1xf32, #tpu.memory_space<vmem>>, vector<8x1xf32>
    tpu.vector_store %arg8[%c0_28, %c0_29], %13 {strides = array<i32>} : memref<8x1xf32, #tpu.memory_space<vmem>>, vector<8x1xf32>,
    %c0_i32_30 = arith.constant 0 : i32
    %32 = arith.cmpi eq, %arg3, %c0_i32_30 : i32
    %33 = arith.extui %32 : i1 to i32
    %c0_i32_31 = arith.constant 0 : i32
    %34 = arith.cmpi ne, %33, %c0_i32_31 : i32
    scf.if %34 {
      %c0_32 = arith.constant 0 : index
      %c0_33 = arith.constant 0 : index
      %35 = vector.load %arg9[%c0_32, %c0_33] : memref<8x1xf32, #tpu.memory_space<vmem>>, vector<8x1xf32>
      %36 = tpu.reciprocal %35 : vector<8x1xf32> -> vector<8x1xf32>
      %c0_34 = arith.constant 0 : index
      %c0_35 = arith.constant 0 : index
      %37 = vector.load %arg10[%c0_34, %c0_35] : memref<8x8xf32, #tpu.memory_space<vmem>>, vector<8x8xf32>
      %38 = vector.broadcast %36 : vector<8x1xf32> to vector<8x8xf32>
      %39 = arith.mulf %37, %38 : vector<8x8xf32>
      %40 = vector.shape_cast %39 : vector<8x8xf32> to vector<1x1x8x8xf32>
      %c0_36 = arith.constant 0 : index
      %c0_37 = arith.constant 0 : index
      %c0_38 = arith.constant 0 : index
      %c0_39 = arith.constant 0 : index
      %41 = vector.load %arg7[%c0_36, %c0_37, %c0_38, %c0_39] : memref<1x1x8x8xf32, #tpu.memory_space<vmem>>, vector<1x1x8x8xf32>
      tpu.vector_store %arg7[%c0_36, %c0_37, %c0_38, %c0_39], %40 {strides = array<i32>} : memref<1x1x8x8xf32, #tpu.memory_space<vmem>>, vector<1x1x8x8xf32>,
    } else {
    }
    return
  }
  func.func @transform_0(%arg0: i32, %arg1: i32, %arg2: i32, %arg3: i32) -> (i32, i32, i32, i32, i32) {
    %c0_i32 = arith.constant 0 : i32
    %c0_i32_0 = arith.constant 0 : i32
    %c0_i32_1 = arith.constant 0 : i32
    return %c0_i32, %arg0, %arg1, %arg2, %c0_i32_0 : i32, i32, i32, i32, i32
  }
  func.func @transform_1(%arg0: i32, %arg1: i32, %arg2: i32, %arg3: i32) -> (i32, i32, i32, i32, i32) {
    %c1_i32 = arith.constant 1 : i32
    %c0_i32 = arith.constant 0 : i32
    %c0_i32_0 = arith.constant 0 : i32
    return %c1_i32, %arg0, %arg1, %arg3, %c0_i32 : i32, i32, i32, i32, i32
  }
  func.func @transform_2(%arg0: i32, %arg1: i32, %arg2: i32, %arg3: i32) -> (i32, i32, i32, i32, i32) {
    %c2_i32 = arith.constant 2 : i32
    %c0_i32 = arith.constant 0 : i32
    %c0_i32_0 = arith.constant 0 : i32
    return %c2_i32, %arg0, %arg1, %arg3, %c0_i32 : i32, i32, i32, i32, i32
  }
  func.func @transform_3(%arg0: i32, %arg1: i32, %arg2: i32, %arg3: i32) -> (i32, i32, i32, i32) {
    %c0_i32 = arith.constant 0 : i32
    %c0_i32_0 = arith.constant 0 : i32
    return %arg1, %arg0, %arg2, %c0_i32 : i32, i32, i32, i32
  }
}

module attributes {stable_mosaic.version = 11 : i64} {
  func.func @_matmul_kernel(%arg0: i32, %arg1: i32, %arg2: i32, %arg3: memref<16x32xf32, #tpu.memory_space<vmem>>, %arg4: memref<32x32xf32, #tpu.memory_space<vmem>>, %arg5: memref<16x32xf32, #tpu.memory_space<vmem>>, %arg6: memref<16x32xf32, #tpu.memory_space<vmem>>) attributes {dimension_semantics = [#tpu.dimension_semantics<parallel>, #tpu.dimension_semantics<parallel>, #tpu.dimension_semantics<arbitrary>], iteration_bounds = array<i64: 1, 1, 1>, scalar_prefetch = 0 : i64, scratch_operands = 1 : i64, tpu.core_type = #tpu.core_type<tc>, window_params = [{transform_indices = @transform_0, window_bounds = array<i64: 16, 32>}, {transform_indices = @transform_1, window_bounds = array<i64: 32, 32>}, {transform_indices = @transform_2, window_bounds = array<i64: 16, 32>}]} {
    %c0_i32 = arith.constant 0 : i32
    %0 = arith.cmpi eq, %arg2, %c0_i32 : i32
    %1 = arith.extui %0 : i1 to i32
    %c0_i32_0 = arith.constant 0 : i32
    %2 = arith.cmpi ne, %1, %c0_i32_0 : i32
    scf.if %2 {
      %cst_10 = arith.constant 0.000000e+00 : f32
      %12 = vector.broadcast %cst_10 : f32 to vector<16x32xf32>
      %c0_11 = arith.constant 0 : index
      %c0_12 = arith.constant 0 : index
      %13 = vector.load %arg6[%c0_11, %c0_12] : memref<16x32xf32, #tpu.memory_space<vmem>>, vector<16x32xf32>
      tpu.vector_store %arg6[%c0_11, %c0_12], %12 {strides = array<i32>} : memref<16x32xf32, #tpu.memory_space<vmem>>, vector<16x32xf32>,
    } else {
    }
    %c0 = arith.constant 0 : index
    %c0_1 = arith.constant 0 : index
    %3 = vector.load %arg6[%c0, %c0_1] : memref<16x32xf32, #tpu.memory_space<vmem>>, vector<16x32xf32>
    %c0_2 = arith.constant 0 : index
    %c0_3 = arith.constant 0 : index
    %4 = vector.load %arg3[%c0_2, %c0_3] : memref<16x32xf32, #tpu.memory_space<vmem>>, vector<16x32xf32>
    %c0_4 = arith.constant 0 : index
    %c0_5 = arith.constant 0 : index
    %5 = vector.load %arg4[%c0_4, %c0_5] : memref<32x32xf32, #tpu.memory_space<vmem>>, vector<32x32xf32>
    %cst = arith.constant dense<0.000000e+00> : vector<16x32xf32>
    %6 = tpu.matmul %4, %5, %cst {dimension_numbers = #tpu.dot_dimension_numbers<[1], [0], [0], [1], [0, 0, 1, 1], [], []>} : vector<16x32xf32>, vector<32x32xf32>, vector<16x32xf32> -> vector<16x32xf32>
    %7 = arith.addf %3, %6 : vector<16x32xf32>
    %c0_6 = arith.constant 0 : index
    %c0_7 = arith.constant 0 : index
    %8 = vector.load %arg6[%c0_6, %c0_7] : memref<16x32xf32, #tpu.memory_space<vmem>>, vector<16x32xf32>
    tpu.vector_store %arg6[%c0_6, %c0_7], %7 {strides = array<i32>} : memref<16x32xf32, #tpu.memory_space<vmem>>, vector<16x32xf32>,
    %c0_i32_8 = arith.constant 0 : i32
    %9 = arith.cmpi eq, %arg2, %c0_i32_8 : i32
    %10 = arith.extui %9 : i1 to i32
    %c0_i32_9 = arith.constant 0 : i32
    %11 = arith.cmpi ne, %10, %c0_i32_9 : i32
    scf.if %11 {
      %c0_10 = arith.constant 0 : index
      %c0_11 = arith.constant 0 : index
      %12 = vector.load %arg6[%c0_10, %c0_11] : memref<16x32xf32, #tpu.memory_space<vmem>>, vector<16x32xf32>
      %c0_12 = arith.constant 0 : index
      %c0_13 = arith.constant 0 : index
      %13 = vector.load %arg5[%c0_12, %c0_13] : memref<16x32xf32, #tpu.memory_space<vmem>>, vector<16x32xf32>
      tpu.vector_store %arg5[%c0_12, %c0_13], %12 {strides = array<i32>} : memref<16x32xf32, #tpu.memory_space<vmem>>, vector<16x32xf32>,
    } else {
    }
    return
  }
  func.func @transform_0(%arg0: i32, %arg1: i32, %arg2: i32) -> (i32, i32) {
    %c0_i32 = arith.constant 0 : i32
    return %arg0, %arg2 : i32, i32
  }
  func.func @transform_1(%arg0: i32, %arg1: i32, %arg2: i32) -> (i32, i32) {
    %c0_i32 = arith.constant 0 : i32
    return %arg2, %arg1 : i32, i32
  }
  func.func @transform_2(%arg0: i32, %arg1: i32, %arg2: i32) -> (i32, i32) {
    %c0_i32 = arith.constant 0 : i32
    return %arg0, %arg1 : i32, i32
  }
}

</mosaic_0001>

<bundles_post_ra>
// kernel: multi_head_self_attention.3
= control target key start
LH: loop header
LB: loop body
LE: loop exit
PB: predicated region body
PF: predicated region fallthrough
CT: control target
= control target key end

     0   :  { %7 = vsyncpa [#allocation4], 0  ;;  %s207_s0 = inlined_call_operand.hbm [shape: f32[16,32], index: 0, kind: input, shape index: {}]   ;;  %s208_s1 = inlined_call_operand.hbm [shape: f32[32,96], index: 1, kind: input, shape index: {}]   ;;  %s209_s2 = inlined_call_operand.vmem [shape: f32[16,96], index: 2, kind: output, shape index: {}]  }
   0x1   :  { %s13_s11 = sshll.u32 %s207_s0, 4  ;;  %s14_s11 = int_to_ptr.hbm [resolvable:$true] %s13_s11 }
   0x2   :  { %8 = vsyncpa [#allocation6], 0  ;;  %s169_s12 = smov [#allocation3]   ;;  %s26_s16 = sshll.u32 %s208_s1, 4  ;;  %s27_s16 = int_to_ptr.hbm [resolvable:$true] %s26_s16 }
   0x3   :  { %s15_s13 = sshll.u32 %s169_s12, 4  ;;  %s170_s17 = smov 128   ;;  %s16_s13 = int_to_ptr.vmem [resolvable:$true] %s15_s13 }
   0x4   :  { %s171_s18 = smov 8   ;;  %s172_s19 = smov [#allocation5]  }
   0x5   :  { %21 = dma.hbm_to_vmem [thread:$0]  %s14_s11, 256, %s16_s13, [#allocation4], %s170_s17, %s170_s17, %s171_s18  }
   0x6   :  { %s28_s20 = sshll.u32 %s172_s19, 4  ;;  %s29_s20 = int_to_ptr.vmem [resolvable:$true] %s28_s20 }
   0x7   :  { %34 = dma.hbm_to_vmem [thread:$0]  %s27_s16, 512, %s29_s20, [#allocation6], %s170_s17, %s170_s17, %s171_s18  }
   0x8   :  { %165 = dma.done.wait [#allocation4], 256  }
   0x9   :  { %166 = vsyncadd [#allocation4], 4294967040 }
   0xa   :  { %167 = dma.done.wait [#allocation6], 512  }
   0xb   :  { %168 = vsyncadd [#allocation6], 4294966784  ;;  %vm47_vm0 = vcmask 785408   ;;  %v173_v0 = vmov 0.0   ;;  %v57_v1 = vld [vmem:[#allocation5 + $0x18] sm:$0xff]  ;;  %v56_v2 = vld [vmem:[#allocation5 + $0x10] sm:$0xff] }
   0xc   :  { %48 = vst.msk [vmem:[#allocation2] sm:$0xff] %vm47_vm0, %v173_v0  ;;  %77 = vmatpush.msra.mxu0 %v57_v1  ;;  %108 = vmatpush.msra.mxu1 %v57_v1  ;;  %v55_v3 = vld [vmem:[#allocation5 + $0x8] sm:$0xff]  ;;  %v54_v4 = vld [vmem:[#allocation5] sm:$0xff]  ;;  %v52_v5 = vld [vmem:[#allocation3] sm:$0xff]  ;;  %vm58_vm1 = vcmask 261120  }
   0xd   :  { %49 = vst.msk [vmem:[#allocation2 + $0x8] sm:$0xff] %vm47_vm0, %v173_v0  ;;  %v53_v6 = vld [vmem:[#allocation3 + $0x8] sm:$0xff] }
   0xe   :  { %78 = vmatpush.msra.mxu0 %v56_v2  ;;  %109 = vmatpush.msra.mxu1 %v56_v2 }
  0x10   :  { %79 = vmatpush.msra.mxu0 %v55_v3  ;;  %110 = vmatpush.msra.mxu1 %v55_v3 }
  0x12   :  { %80 = vmatpush.msra.mxu0 %v54_v4  ;;  %111 = vmatpush.msra.mxu1 %v54_v4 }
  0x13   :  { %106 = vmatmul.msk.f32.vlgmr.msra.gmra.mxu0 %vm58_vm1, %v52_v5  ;;  %107 = vmatmul.msk.f32.vlgmr.msra.gmra.mxu1 %vm58_vm1, %v53_v6  ;;  %v50_v7 = vld [vmem:[#allocation2] sm:$0xff] }
  0x14   :  { %v51_v8 = vld [vmem:[#allocation2 + $0x8] sm:$0xff] }
  0x90   :  { %v82_v9 = vpop.f32.mrf.mxu0  ;;  %v85_v10 = vpop.f32.mrf.mxu1 }
  0x91   :  { %v88_v11 = vadd.f32 %v82_v9, %v50_v7  ;;  %v89_v12 = vadd.f32 %v85_v10, %v51_v8 }
  0x93   :  { %91 = vst.msk [vmem:[#allocation2] sm:$0xff] %vm47_vm0, %v88_v11 }
  0x94   :  { %92 = vst.msk [vmem:[#allocation2 + $0x8] sm:$0xff] %vm47_vm0, %v89_v12 }
  0x9a   :  { %v96_v13 = vld [vmem:[#allocation2] sm:$0xff] }
  0x9b   :  { %98 = vst.msk [vmem:[%s209_s2] sm:$0xff] %vm47_vm0, %v96_v13  ;;  %v97_v14 = vld [vmem:[#allocation2 + $0x8] sm:$0xff] }
  0x9c   :  { %99 = vst.msk [vmem:[%s209_s2 + $0x8] sm:$0xff] %vm47_vm0, %v97_v14 }
  0x9d   :  { %104 = vsyncpa [#allocation4], 1 }
  0x9e   :  { %105 = vsyncpa [#allocation6], 1 }

// kernel: multi_head_self_attention.4
= control target key start
LH: loop header
LB: loop body
LE: loop exit
PB: predicated region body
PF: predicated region fallthrough
CT: control target
= control target key end

     0   :  { %s735_s12 = smov 0   ;;  %s737_s13 = smov 0   ;;  %s812_s0 = inlined_call_operand.vmem [shape: f32[3,4,2,8,8], index: 0, kind: input, shape index: {}, may-alias: {0,1,2}]   ;;  %s813_s1 = inlined_call_operand.vmem [shape: f32[3,4,2,8,8], index: 1, kind: input, shape index: {}, may-alias: {0,1,2}]   ;;  %s814_s2 = inlined_call_operand.vmem [shape: f32[3,4,2,8,8], index: 2, kind: input, shape index: {}, may-alias: {0,1,2}]   ;;  %s815_s3 = inlined_call_operand.vmem [shape: f32[2,4,8,8], index: 3, kind: output, shape index: {}]  }
   0x1   :  { %s739_s14 = smov 0   ;;  %s741_s15 = smov 0  }
   0x2   :  { %s743_s16 = smov 0  }
   0x3 LB: > { %s35_s17 = sadd.s32 1, %s702_s14  ;;  %s39_s18 = sadd.s32 1, %s706_s15  ;;  %s710_s16 = sphi %s743_s16, %s13_s16   ;;  %s706_s15 = sphi %s741_s15, %s819_s15   ;;  %s702_s14 = sphi %s739_s14, %s818_s14   ;;  %s698_s13 = sphi %s737_s13, %s817_s13   ;;  %s694_s12 = sphi %s735_s12, %s816_s12  }
   0x4   : > { %p37_p0 = scmp.ge.s32.totalorder %s35_s17, 2  ;;  %p604_p1 = scmp.ge.s32.totalorder %s710_s16, 1 }
   0x5   : > { %p219_p2 = scmp.lt.s32.totalorder %s710_s16, 9 }
   0x6   : > { %s821_s17 = smov (%p37_p0, %s35_s17), 0  ;;  %s823_s18 = smov (!%p37_p0, %s39_s18), %s706_s15 }
   0x7   : > { %p220_p3 = pnand %p604_p1, %p219_p2  ;;  %p41_p4 = scmp.ge.s32.totalorder %s823_s18, 4 }
   0x8   : > { %p279_p5 = scmp.lt.s32.totalorder (!%p220_p3), %s698_s13, 3  ;;  %p281_p6 = scmp.lt.s32.totalorder (!%p220_p3), %s694_s12, 1 }
   0x9   : > { %s825_s18 = smov (%p41_p4, %s823_s18), 0  ;;  %223 = sbr.rel (%p220_p3) target bundleno = 632 (0x278), region = 32 }
   0xe   : > { %s827_s13 = smov (!%p279_p5, %s698_s13), 3  ;;  %s829_s12 = smov (!%p281_p6, %s694_s12), 1  ;;  %vm332_vm0 = vcmask 64512   ;;  %vm329_vm1 = vcmask 7168   ;;  %v712_v2 = vmov -inf   ;;  %v713_v5 = vmov 0  }
   0xf   : > { %s605_s19 = sshll.u32 %s827_s13, 1  ;;  %330 = vst.msk [vmem:[#allocation2] sm:$0xff] %vm329_vm1, %v712_v2  ;;  %663 = vset.pattern.permute.xlu0 %v713_v5  ;;  %664 = vset.pattern.permute.xlu1 %v713_v5  ;;  %v714_v6 = vmov 0.0   ;;  %s611_s4 = sshll.u32 %s829_s12, 2 }
  0x10   : > { %s287_s20 = sadd.s32 %s605_s19, %s829_s12  ;;  %665 = vset.pattern.permute.xlu2 %v713_v5  ;;  %331 = vst.msk [vmem:[#allocation3] sm:$0xff] %vm329_vm1, %v714_v6  ;;  %s322_s5 = sadd.s32 %s611_s4, %s827_s13 }
  0x11   : > { %s606_s21 = sshll.u32 %s287_s20, 3  ;;  %333 = vst.msk [vmem:[#allocation4] sm:$0xff] %vm332_vm0, %v714_v6  ;;  %s612_s6 = sshll.u32 %s322_s5, 3 }
  0x12   : > { %s528_s24 = scalar_lea.vmem %s813_s1, %s606_s21  ;;  %s289_s27 = scalar_lea.vmem %s812_s0, %s606_s21 }
  0x13   : > { %v613_v0 = vld [vmem:[%s528_s24 + $0x40] sm:$0xff]  ;;  %s534_s30 = scalar_lea.vmem %s814_s2, %s606_s21  ;;  %s324_s9 = scalar_lea.vmem %s815_s3, %s612_s6 }
  0x14   : > { %615 = vmatpush.xpose.msk.msra.mxu0 %vm332_vm0, %v613_v0  ;;  %v334_v1 = vld [vmem:[%s289_s27] sm:$0xff] }
  0x15   : > { %v614_v11 = vld [vmem:[%s534_s30 + $0x80] sm:$0xff] }
  0x16   : > { %v364_v7 = vld [vmem:[#allocation2] sm:$0xff]  ;;  %413 = vmatpush.msra.mxu1 %v614_v11 }
  0x17   : > { %616 = vmatmul.msk.f32.vlgmr.msra.gmra.mxu0 %vm332_vm0, %v334_v1  ;;  %v380_v19 = vld [vmem:[#allocation3] sm:$0xff] }
  0x18   : > { %v388_v28 = vld [vmem:[#allocation4] sm:$0xff] }
  0x94   : > { %v361_v3 = vpop.f32.mrf.mxu0 }
  0x95   : > { %v365_v4 = vsel %vm332_vm0, %v361_v3, -inf }
  0x96   : > { %366 = vmax.xlane.f32.xlu0 %v365_v4 }
 0x109   : > { %v367_v8 = vpop.xlane.xlu0 %366 }
 0x10a   : > { %v368_v9 = vmax.f32 %v364_v7, %v367_v8 }
 0x10c   : > { %v369_v10 = vsub.f32 %v364_v7, %v368_v9  ;;  %420 = vst.msk [vmem:[#allocation2] sm:$0xff] %vm329_vm1, %v368_v9  ;;  %374 = vperm.xlu0 %663, %v368_v9  }
 0x10e   : > { %v370_v17 = vmul.f32 1.442695, %v369_v10 }
 0x17e   : > { %v375_v12 = vpop.permute.xlu0 %374 }
 0x17f   : > { %v377_v13 = vsub.f32 %v361_v3, %v375_v12 }
 0x181   : > { %v378_v14 = vmul.f32 1.442695, %v377_v13 }
 0x183   : > { %666 = vpow2.f32 %v378_v14 }
 0x184   : > { %668 = vpow2.f32 %v370_v17 }
 0x189   : > { %v667_v15 = vpop.eup %666 }
 0x18a   : > { %617 = vmatmul.msk.f32.vlgmr.msra.gmra.mxu1 %vm332_vm0, %v667_v15  ;;  %v382_v16 = vsel %vm332_vm0, %v667_v15, 0.0  ;;  %v669_v18 = vpop.eup %668 }
 0x18b   : > { %383 = vadd.xlane.f32.xlu1 %v382_v16  ;;  %v381_v20 = vmul.f32 %v669_v18, %v380_v19 }
 0x1a4   : > { %391 = vperm.xlu1 %664, %v669_v18  }
 0x1fe   : > { %v384_v21 = vpop.xlane.xlu1 %383 }
 0x1ff   : > { %v385_v22 = vadd.f32 %v384_v21, %v381_v20 }
 0x201   : > { %387 = vst.msk [vmem:[#allocation3] sm:$0xff] %vm329_vm1, %v385_v22 }
 0x207   : > { %v415_v35 = vpop.f32.mrf.mxu1 }
 0x208   : > { %v424_v23 = vld [vmem:[#allocation3] sm:$0xff] }
 0x209   : > { %670 = vrcp.f32 %v424_v23  ;;  %v436_v27 = vand.u32 2147483648, %v424_v23  ;;  %v434_v30 = vand.u32 2147483647, %v424_v23  ;;  %vm430_vm3 = vweird.f32 %v424_v23 }
 0x20b   : > { %v437_v34 = vor.u32 1.1754944e-38, %v436_v27  ;;  %vm435_vm5 = vcmp.eq.f32.partialorder %v434_v30, 8.507059e+37 }
 0x20f   : > { %v671_v24 = vpop.eup %670 }
 0x210   : > { %v426_v25 = vmul.f32 %v671_v24, %v424_v23  ;;  %vm431_vm2 = vweird.f32 %v671_v24 }
 0x211   : > { %vm432_vm4 = vmor %vm430_vm3, %vm431_vm2 }
 0x212   : > { %v427_v26 = vsub.f32 1.0, %v426_v25 }
 0x214   : > { %v428_v29 = vmul.f32 %v671_v24, %v427_v26 }
 0x216   : > { %v392_v31 = vpop.permute.xlu1 %391  ;;  %v429_v32 = vadd.f32 %v671_v24, %v428_v29 }
 0x217   : > { %v394_v33 = vmul.f32 %v392_v31, %v388_v28 }
 0x218   : > { %v433_v36 = vsel %vm432_vm4, %v671_v24, %v429_v32 }
 0x219   : > { %v418_v37 = vadd.f32 %v415_v35, %v394_v33  ;;  %v438_v38 = vsel %vm435_vm5, %v437_v34, %v433_v36 }
 0x21a   : > { %442 = vperm.xlu2 %665, %v438_v38  }
 0x21b   : > { %419 = vst.msk [vmem:[#allocation4] sm:$0xff] %vm332_vm0, %v418_v37 }
 0x222   : > { %v439_v39 = vld [vmem:[#allocation4] sm:$0xff] }
 0x274   : > { %v443_v40 = vpop.permute.xlu2 %442 }
 0x275   : > { %v445_v41 = vmul.f32 %v443_v40, %v439_v39 }
 0x277   : > { %446 = vst.msk [vmem:[%s324_s9] sm:$0xff] %vm332_vm0, %v445_v41 }
 0x278 PF: > { %s13_s16 = sadd.s32 1, %s710_s16   ;;  %s816_s12 = smov %s702_s14 }
 0x279   : > { %p10_p7 = scmp.ge.s32.totalorder %s13_s16, 10   ;;  %s817_s13 = smov %s706_s15 }
 0x27a   : > { %s818_s14 = smov %s821_s17  ;;  %s819_s15 = smov %s825_s18 }
 0x27b   :  { %12 = sbr.rel (!%p10_p7) target bundleno = 3 (0x3), region = 76 }

// kernel: multi_head_self_attention.5
= control target key start
LH: loop header
LB: loop body
LE: loop exit
PB: predicated region body
PF: predicated region fallthrough
CT: control target
= control target key end

     0   :  { %vm16_vm0 = vcmask 261120   ;;  %v122_v2 = vmov 0.0   ;;  %s170_s0 = inlined_call_operand.vmem [shape: f32[16,32], index: 0, kind: input, shape index: {}]   ;;  %s171_s1 = inlined_call_operand.vmem [shape: f32[32,32], index: 1, kind: input, shape index: {}]   ;;  %s172_s2 = inlined_call_operand.hbm [shape: f32[16,32], index: 2, kind: output, shape index: {}]  }
   0x1   :  { %v26_v0 = vld [vmem:[%s171_s1 + $0x18] sm:$0xff]  ;;  %v25_v1 = vld [vmem:[%s171_s1 + $0x10] sm:$0xff]  ;;  %17 = vst.msk [vmem:[#allocation2] sm:$0xff] %vm16_vm0, %v122_v2  ;;  %v24_v3 = vld [vmem:[%s171_s1 + $0x8] sm:$0xff] }
   0x2   :  { %46 = vmatpush.msra.mxu0 %v26_v0  ;;  %88 = vmatpush.msra.mxu1 %v26_v0  ;;  %18 = vst.msk [vmem:[#allocation2 + $0x8] sm:$0xff] %vm16_vm0, %v122_v2 }
   0x3   :  { %7 = vsyncpa [#allocation4], 0  ;;  %v23_v4 = vld [vmem:[%s171_s1] sm:$0xff]  ;;  %v22_v6 = vld [vmem:[%s170_s0 + $0x8] sm:$0xff]  ;;  %s123_s1 = smov [#allocation3]   ;;  %s74_s23 = sshll.u32 %s172_s2, 4  ;;  %s75_s23 = int_to_ptr.hbm [resolvable:$true] %s74_s23 }
   0x4   :  { %47 = vmatpush.msra.mxu0 %v25_v1  ;;  %89 = vmatpush.msra.mxu1 %v25_v1  ;;  %v21_v5 = vld [vmem:[%s170_s0] sm:$0xff]  ;;  %s72_s21 = sshll.u32 %s123_s1, 4  ;;  %s124_s24 = smov 128   ;;  %s73_s21 = int_to_ptr.vmem [resolvable:$true] %s72_s21 }
   0x5   :  { %s125_s25 = smov 8  }
   0x6   :  { %48 = vmatpush.msra.mxu0 %v24_v3  ;;  %90 = vmatpush.msra.mxu1 %v24_v3 }
   0x8   :  { %49 = vmatpush.msra.mxu0 %v23_v4  ;;  %91 = vmatpush.msra.mxu1 %v23_v4  ;;  %v19_v7 = vld [vmem:[#allocation2] sm:$0xff] }
   0x9   :  { %86 = vmatmul.msk.f32.vlgmr.msra.gmra.mxu0 %vm16_vm0, %v21_v5  ;;  %87 = vmatmul.msk.f32.vlgmr.msra.gmra.mxu1 %vm16_vm0, %v22_v6  ;;  %v20_v8 = vld [vmem:[#allocation2 + $0x8] sm:$0xff] }
  0x86   :  { %v51_v9 = vpop.f32.mrf.mxu0  ;;  %v54_v10 = vpop.f32.mrf.mxu1 }
  0x87   :  { %v57_v11 = vadd.f32 %v51_v9, %v19_v7  ;;  %v58_v12 = vadd.f32 %v54_v10, %v20_v8 }
  0x89   :  { %59 = vst.msk [vmem:[#allocation2] sm:$0xff] %vm16_vm0, %v57_v11 }
  0x8a   :  { %60 = vst.msk [vmem:[#allocation2 + $0x8] sm:$0xff] %vm16_vm0, %v58_v12 }
  0x90   :  { %v64_v13 = vld [vmem:[#allocation2] sm:$0xff] }
  0x91   :  { %v65_v14 = vld [vmem:[#allocation2 + $0x8] sm:$0xff]  ;;  %66 = vst.msk [vmem:[#allocation3] sm:$0xff] %vm16_vm0, %v64_v13 }
  0x92   :  { %67 = vst.msk [vmem:[#allocation3 + $0x8] sm:$0xff] %vm16_vm0, %v65_v14 }
  0x93   :  { %80 = dma.vmem_to_hbm [thread:$0]  %s73_s21, 256, %s75_s23, [#allocation4], %s124_s24, %s124_s24, %s125_s25  }
  0x94   :  { %120 = dma.done.wait [#allocation4], 256  }
  0x95   :  { %121 = vsyncadd [#allocation4], 4294967040 }
  0x96   :  { %85 = vsyncpa [#allocation4], 1 }

</bundles_post_ra>
